<compile_context>
chip_gen: v5e
topology: v5e:2x2
jax: 0.10.0
libtpu: 0.0.40
codegen_flags: <defaults>
</compile_context>

<pallas_src>
import functools
import math

import jax
import jax.numpy as jnp
from jax.experimental import pallas as pl
from jax.experimental.pallas import tpu as pltpu


def _round_up(x, m):
    return ((x + m - 1) // m) * m


def _col_kernel(x_ref, w_ref, b_ref, o_ref, *, eps):
    # x_ref: (tm, C) VMEM   w_ref: (1, C) VMEM (resident)   b_ref: (1,1) SMEM
    # o_ref: (tm, 1) VMEM   -- column output (used when C is large / rows ragged)
    x = x_ref[...]
    w = w_ref[...]                                   # already x.dtype (cast hoisted)
    y = jnp.sum((x * w).astype(jnp.float32), axis=-1, keepdims=True)   # (tm, 1) f32
    y = jnp.maximum(y + b_ref[0, 0], 0.0) + eps
    o_ref[...] = y.astype(o_ref.dtype)


def _slab_kernel(x_ref, w_ref, b_ref, o_ref, *, eps):
    # x_ref: (tg, 128, C) VMEM   w_ref: (1, 1, C) VMEM (resident)   b_ref: (1,1) SMEM
    # o_ref: (tg, 128) VMEM  -- lane-dense output slab (full-width stores)
    x = x_ref[...]
    w = w_ref[...]                                   # broadcasts (1,1,C) -> (tg,128,C)
    y = jnp.sum((x * w).astype(jnp.float32), axis=-1)                  # (tg, 128) f32
    y = jnp.maximum(y + b_ref[0, 0], 0.0) + eps
    o_ref[...] = y.astype(o_ref.dtype)


def scale_predictor(x, weight, bias, *, eps=0.1,
                    target_block_bytes=2 * 1024 * 1024, block_rows=None):
    """Fused nn.Linear(in_channel, 1) -> relu -> +eps.

    x:      (..., C)
    weight: (1, C)   (PyTorch nn.Linear weight layout)
    bias:   (1,)
    returns (..., 1), dtype of x.
    """
    *lead, c = x.shape
    assert weight.shape == (1, c), "weight must be (1, in_channel)"
    assert bias.shape == (1,), "bias must be (1,)"

    m = math.prod(lead) if lead else 1
    itemsize = jnp.dtype(x.dtype).itemsize

    # Row budget per input block (double-buffered by the pipeliner); inverse in C.
    if block_rows is None:
        budget_rows = max(target_block_bytes // (c * itemsize), 8)
    else:
        budget_rows = max(int(block_rows), 8)

    w2 = weight.astype(x.dtype)                      # hoist the weight cast out of the kernel
    b_smem = bias.reshape(1, 1).astype(jnp.float32)  # scalar bias in SMEM

    cost = pl.CostEstimate(
        flops=2 * m * c,
        transcendentals=0,
        bytes_accessed=m * c * itemsize + c * itemsize + m * itemsize,
    )
    cparams = pltpu.CompilerParams(dimension_semantics=("parallel",))

    # Lane-dense output path: rows must form whole 128-row groups (free reshape,
    # no padding pass) and the byte budget must allow >=1024-row tiles (so the
    # output block's sublane dim is a multiple of 8) or a single block.
    lane_dense = (m % 128 == 0) and (budget_rows >= min(m, 1024))

    if lane_dense:
        groups = m // 128
        tm = m if budget_rows >= m else (budget_rows // 1024) * 1024
        tg = tm // 128
        x3 = x.reshape(groups, 128, c)               # contiguous reshape: no HBM pass
        grid = (pl.cdiv(groups, tg),)
        out = pl.pallas_call(
            functools.partial(_slab_kernel, eps=eps),
            out_shape=jax.ShapeDtypeStruct((groups, 128), x.dtype),
            grid=grid,
            in_specs=[
                pl.BlockSpec((tg, 128, c), lambda i: (i, 0, 0)),      # stream row tiles
                pl.BlockSpec((1, 1, c), lambda i: (0, 0, 0)),         # resident weight
                pl.BlockSpec(memory_space=pltpu.MemorySpace.SMEM),    # scalar bias
            ],
            out_specs=pl.BlockSpec((tg, 128), lambda i: (i, 0)),      # lane-dense slab
            compiler_params=cparams,
            cost_estimate=cost,
        )(x3, w2.reshape(1, 1, c), b_smem)
        out = out.reshape(m, 1)
    else:
        tm = min((budget_rows // 8) * 8, _round_up(m, 8))
        grid = (pl.cdiv(m, tm),)                     # ragged last block handled by Pallas
        x2 = x.reshape(m, c)
        out = pl.pallas_call(
            functools.partial(_col_kernel, eps=eps),
            out_shape=jax.ShapeDtypeStruct((m, 1), x.dtype),
            grid=grid,
            in_specs=[
                pl.BlockSpec((tm, c), lambda i: (i, 0)),              # stream row tiles
                pl.BlockSpec((1, c), lambda i: (0, 0)),               # resident weight
                pl.BlockSpec(memory_space=pltpu.MemorySpace.SMEM),    # scalar bias
            ],
            out_specs=pl.BlockSpec((tm, 1), lambda i: (i, 0)),
            compiler_params=cparams,
            cost_estimate=cost,
        )(x2, w2, b_smem)

    return out.reshape(*lead, 1) if lead else out.reshape(1)


def _reference(x, weight, bias, eps=0.1):
    # Direct transcription of the PyTorch forward (elementwise + reduce in f32).
    y = jnp.sum(x * weight[0], axis=-1, keepdims=True) + bias
    return jnp.maximum(y, 0.0) + eps


if __name__ == "__main__":
    key = jax.random.PRNGKey(0)
    kx1, kx2, kx3, kx4, kw, kb = jax.random.split(key, 6)

    in_channel = 32
    weight = jax.random.normal(kw, (1, in_channel), dtype=jnp.float32) * 0.1
    bias = jax.random.normal(kb, (1,), dtype=jnp.float32)

    # 1) Lane-dense single-block path (m = 2*128 = 256 rows).
    x1 = jax.random.normal(kx1, (2, 128, in_channel), dtype=jnp.float32)
    y1 = scale_predictor(x1, weight, bias)
    jax.block_until_ready(y1)
    assert y1.shape == (2, 128, 1)
    assert jnp.allclose(y1, _reference(x1, weight, bias), atol=1e-5, rtol=1e-5)

    # 2) Lane-dense multi-tile path with a ragged last block
    #    (m = 17*128 = 2176 rows, 1024-row tiles -> grid of 3).
    x2 = jax.random.normal(kx2, (17, 128, in_channel), dtype=jnp.float32)
    y2 = scale_predictor(x2, weight, bias, block_rows=1024)
    jax.block_until_ready(y2)
    assert y2.shape == (17, 128, 1)
    assert jnp.allclose(y2, _reference(x2, weight, bias), atol=1e-5, rtol=1e-5)

    # 3) Column-output fallback, single block (m = 16 rows, not a 128 multiple).
    x3 = jax.random.normal(kx3, (2, 8, in_channel), dtype=jnp.float32)
    y3 = scale_predictor(x3, weight, bias)
    jax.block_until_ready(y3)
    assert y3.shape == (2, 8, 1)
    assert jnp.allclose(y3, _reference(x3, weight, bias), atol=1e-5, rtol=1e-5)

    # 4) Column-output fallback, multi-step grid with ragged rows (m = 21, tile 8 -> grid 3).
    x4 = jax.random.normal(kx4, (3, 7, in_channel), dtype=jnp.float32)
    y4 = scale_predictor(x4, weight, bias, block_rows=8)
    jax.block_until_ready(y4)
    assert y4.shape == (3, 7, 1)
    assert jnp.allclose(y4, _reference(x4, weight, bias), atol=1e-5, rtol=1e-5)

    print("KERNEL_OK")
</pallas_src>

<mosaic_0001>
module attributes {stable_mosaic.version = 11 : i64} {
  func.func @_slab_kernel(%arg0: i32, %arg1: memref<2x128x32xf32, #tpu.memory_space<vmem>>, %arg2: memref<1x1x32xf32, #tpu.memory_space<vmem>>, %arg3: memref<1x1xf32, #tpu.memory_space<smem>>, %arg4: memref<2x128xf32, #tpu.memory_space<vmem>>) attributes {dimension_semantics = [#tpu.dimension_semantics<parallel>], iteration_bounds = array<i64: 1>, scalar_prefetch = 0 : i64, scratch_operands = 0 : i64, tpu.core_type = #tpu.core_type<tc>, window_params = [{transform_indices = @transform_0, window_bounds = array<i64: 2, 128, 32>}, {pipeline_mode = #tpu.pipeline_mode<synchronous>, transform_indices = @transform_1, window_bounds = array<i64: 1, 1, 32>}, {transform_indices = @transform_2, window_bounds = array<i64: 1, 1>}, {transform_indices = @transform_3, window_bounds = array<i64: 2, 128>}]} {
    %c0 = arith.constant 0 : index
    %c0_0 = arith.constant 0 : index
    %c0_1 = arith.constant 0 : index
    %0 = vector.load %arg1[%c0, %c0_0, %c0_1] : memref<2x128x32xf32, #tpu.memory_space<vmem>>, vector<2x128x32xf32>
    %c0_2 = arith.constant 0 : index
    %c0_3 = arith.constant 0 : index
    %c0_4 = arith.constant 0 : index
    %1 = vector.load %arg2[%c0_2, %c0_3, %c0_4] : memref<1x1x32xf32, #tpu.memory_space<vmem>>, vector<1x1x32xf32>
    %2 = vector.broadcast %1 : vector<1x1x32xf32> to vector<2x128x32xf32>
    %3 = arith.mulf %0, %2 : vector<2x128x32xf32>
    %cst = arith.constant dense<0.000000e+00> : vector<2x128xf32>
    %4 = vector.multi_reduction <add>, %3, %cst [2] : vector<2x128x32xf32> to vector<2x128xf32>
    %c0_5 = arith.constant 0 : index
    %c0_6 = arith.constant 0 : index
    %5 = memref.load %arg3[%c0_5, %c0_6] : memref<1x1xf32, #tpu.memory_space<smem>>
    %6 = vector.broadcast %5 : f32 to vector<2x128xf32>
    %7 = arith.addf %4, %6 : vector<2x128xf32>
    %cst_7 = arith.constant 0.000000e+00 : f32
    %8 = vector.broadcast %cst_7 : f32 to vector<2x128xf32>
    %9 = arith.maximumf %7, %8 : vector<2x128xf32>
    %cst_8 = arith.constant 1.000000e-01 : f32
    %10 = vector.broadcast %cst_8 : f32 to vector<2x128xf32>
    %11 = arith.addf %9, %10 : vector<2x128xf32>
    %c0_9 = arith.constant 0 : index
    %c0_10 = arith.constant 0 : index
    %12 = vector.load %arg4[%c0_9, %c0_10] : memref<2x128xf32, #tpu.memory_space<vmem>>, vector<2x128xf32>
    tpu.vector_store %arg4[%c0_9, %c0_10], %11 {strides = array<i32>} : memref<2x128xf32, #tpu.memory_space<vmem>>, vector<2x128xf32>,
    return
  }
  func.func @transform_0(%arg0: i32) -> (i32, i32, i32) {
    %c0_i32 = arith.constant 0 : i32
    %c0_i32_0 = arith.constant 0 : i32
    %c0_i32_1 = arith.constant 0 : i32
    return %arg0, %c0_i32, %c0_i32_0 : i32, i32, i32
  }
  func.func @transform_1(%arg0: i32) -> (i32, i32, i32) {
    %c0_i32 = arith.constant 0 : i32
    %c0_i32_0 = arith.constant 0 : i32
    %c0_i32_1 = arith.constant 0 : i32
    %c0_i32_2 = arith.constant 0 : i32
    return %c0_i32, %c0_i32_0, %c0_i32_1 : i32, i32, i32
  }
  func.func @transform_2(%arg0: i32) -> (i32, i32) {
    %c0_i32 = arith.constant 0 : i32
    %c0_i32_0 = arith.constant 0 : i32
    %c0_i32_1 = arith.constant 0 : i32
    return %c0_i32, %c0_i32_0 : i32, i32
  }
  func.func @transform_3(%arg0: i32) -> (i32, i32) {
    %c0_i32 = arith.constant 0 : i32
    %c0_i32_0 = arith.constant 0 : i32
    return %arg0, %c0_i32 : i32, i32
  }
}

</mosaic_0001>

<bundles_post_ra>
// kernel: tpu_custom_call.1
= control target key start
LH: loop header
LB: loop body
LE: loop exit
PB: predicated region body
PF: predicated region fallthrough
CT: control target
= control target key end

     0   :  { %vm84_vm0 = vcmask 261120   ;;  %s763_s0 = inlined_call_operand.vmem [shape: f32[2,128,32], index: 0, kind: input, shape index: {}]   ;;  %s764_s1 = inlined_call_operand.vmem [shape: f32[1,1,32], index: 1, kind: input, shape index: {}]   ;;  %s765_s2 = inlined_call_operand.<no memory space> [shape: f32[1,1], index: 2, kind: input, shape index: {}]   ;;  %s766_s3 = inlined_call_operand.hbm [shape: f32[2,128], index: 3, kind: output, shape index: {}]  }
   0x1   :  { %v18_v0 = vld [vmem:[%s763_s0 + $0x10] sm:$0xff]  ;;  %v480_v1 = vld [vmem:[%s764_s1] ss:$0 sm:$0xff]  ;;  %v19_v7 = vld [vmem:[%s763_s0 + $0x18] sm:$0xff] }
   0x2   :  { %v16_v2 = vld [vmem:[%s763_s0] sm:$0xff]  ;;  %v54_v4 = vmul.f32 %v480_v1, %v18_v0  ;;  %v17_v8 = vld [vmem:[%s763_s0 + $0x8] sm:$0xff]  ;;  %v55_v13 = vmul.f32 %v480_v1, %v19_v7 }
   0x3   :  { %v20_v3 = vld [vmem:[%s763_s0 + $0x20] sm:$0xff]  ;;  %v52_v5 = vmul.f32 %v480_v1, %v16_v2  ;;  %v21_v12 = vld [vmem:[%s763_s0 + $0x28] sm:$0xff]  ;;  %v53_v14 = vmul.f32 %v480_v1, %v17_v8 }
   0x4   :  { %v56_v6 = vmul.f32 %v480_v1, %v20_v3  ;;  %v91_v9 = vsel %vm84_vm0, %v54_v4, 0.0 }
   0x5   :  { %v85_v10 = vsel %vm84_vm0, %v52_v5, 0.0  ;;  %92 = vadd.xlane.f32.xlu1 %v91_v9 }
   0x6   :  { %v97_v11 = vsel %vm84_vm0, %v56_v6, 0.0  ;;  %86 = vadd.xlane.f32.xlu0 %v85_v10 }
   0x7   :  { %98 = vadd.xlane.f32.xlu2 %v97_v11 }
   0x8   :  { %9 = vsyncpa [#allocation4], 0  ;;  %v57_v15 = vmul.f32 %v480_v1, %v21_v12  ;;  %v94_v16 = vsel %vm84_vm0, %v55_v13, 0.0  ;;  %v88_v17 = vsel %vm84_vm0, %v53_v14, 0.0  ;;  %v23_v19 = vld [vmem:[%s763_s0 + $0x38] sm:$0xff]  ;;  %v22_v20 = vld [vmem:[%s763_s0 + $0x30] sm:$0xff] }
   0x9   :  { %v24_v21 = vld [vmem:[%s763_s0 + $0x40] sm:$0xff]  ;;  %v59_v22 = vmul.f32 %v480_v1, %v23_v19  ;;  %v58_v23 = vmul.f32 %v480_v1, %v22_v20  ;;  %v26_v28 = vld [vmem:[%s763_s0 + $0x50] sm:$0xff]  ;;  %v25_v29 = vld [vmem:[%s763_s0 + $0x48] sm:$0xff]  ;;  %vm316_vm1 = vcmask 130112   ;;  %vm320_vm2 = vcmask 195712   ;;  %s416_s25 = sshll.u32 %s766_s3, 4  ;;  %s417_s25 = int_to_ptr.hbm [resolvable:$true] %s416_s25 }
   0xa   :  { %v100_v18 = vsel %vm84_vm0, %v57_v15, 0.0  ;;  %v60_v24 = vmul.f32 %v480_v1, %v24_v21  ;;  %v32_v30 = vld [vmem:[%s763_s0 + $0x80] sm:$0xff]  ;;  %v62_v31 = vmul.f32 %v480_v1, %v26_v28  ;;  %v61_v32 = vmul.f32 %v480_v1, %v25_v29  ;;  %v34_v37 = vld [vmem:[%s763_s0 + $0x90] sm:$0xff]  ;;  %v33_v38 = vld [vmem:[%s763_s0 + $0x88] sm:$0xff] }
   0xb   :  { %v106_v25 = vsel %vm84_vm0, %v59_v22, 0.0  ;;  %v103_v26 = vsel %vm84_vm0, %v58_v23, 0.0  ;;  %v68_v33 = vmul.f32 %v480_v1, %v32_v30  ;;  %v35_v39 = vld [vmem:[%s763_s0 + $0x98] sm:$0xff]  ;;  %v70_v40 = vmul.f32 %v480_v1, %v34_v37  ;;  %v44_v42 = vld [vmem:[%s763_s0 + $0xe0] sm:$0xff]  ;;  %v29_v50 = vld [vmem:[%s763_s0 + $0x68] sm:$0xff] }
   0xc   :  { %v109_v27 = vsel %vm84_vm0, %v60_v24, 0.0  ;;  %v115_v34 = vsel %vm84_vm0, %v62_v31, 0.0  ;;  %v112_v35 = vsel %vm84_vm0, %v61_v32, 0.0  ;;  %v69_v41 = vmul.f32 %v480_v1, %v33_v38  ;;  %v28_v46 = vld [vmem:[%s763_s0 + $0x60] sm:$0xff]  ;;  %v37_v52 = vld [vmem:[%s763_s0 + $0xa8] sm:$0xff]  ;;  %v38_v55 = vld [vmem:[%s763_s0 + $0xb0] sm:$0xff] }
   0xd   :  { %95 = vadd.xlane.f32.xlu1 %v94_v16  ;;  %v133_v36 = vsel %vm84_vm0, %v68_v33, 0.0  ;;  %v71_v43 = vmul.f32 %v480_v1, %v35_v39  ;;  %v80_v44 = vmul.f32 %v480_v1, %v44_v42  ;;  %v139_v47 = vsel %vm84_vm0, %v70_v40, 0.0  ;;  %v36_v53 = vld [vmem:[%s763_s0 + $0xa0] sm:$0xff]  ;;  %v30_v60 = vld [vmem:[%s763_s0 + $0x70] sm:$0xff]  ;;  %v45_v0 = vld [vmem:[%s763_s0 + $0xe8] sm:$0xff] }
   0xe   :  { %89 = vadd.xlane.f32.xlu0 %v88_v17  ;;  %v136_v48 = vsel %vm84_vm0, %v69_v41, 0.0  ;;  %v64_v49 = vmul.f32 %v480_v1, %v28_v46  ;;  %v65_v54 = vmul.f32 %v480_v1, %v29_v50  ;;  %v73_v58 = vmul.f32 %v480_v1, %v37_v52  ;;  %v46_v5 = vld [vmem:[%s763_s0 + $0xf0] sm:$0xff]  ;;  %v40_v7 = vld [vmem:[%s763_s0 + $0xc0] sm:$0xff]  ;;  %v39_v8 = vld [vmem:[%s763_s0 + $0xb8] sm:$0xff] }
   0xf   :  { %101 = vadd.xlane.f32.xlu2 %v100_v18  ;;  %v556_v45 = vsel %vm84_vm0, %v80_v44, 0.0  ;;  %v142_v51 = vsel %vm84_vm0, %v71_v43, 0.0  ;;  %v72_v59 = vmul.f32 %v480_v1, %v36_v53  ;;  %v74_v61 = vmul.f32 %v480_v1, %v38_v55  ;;  %v41_v10 = vld [vmem:[%s763_s0 + $0xc8] sm:$0xff]  ;;  %v47_v15 = vld [vmem:[%s763_s0 + $0xf8] sm:$0xff] }
  0x10   :  { %v121_v56 = vsel %vm84_vm0, %v64_v49, 0.0  ;;  %v124_v57 = vsel %vm84_vm0, %v65_v54, 0.0  ;;  %v66_v62 = vmul.f32 %v480_v1, %v30_v60  ;;  %v148_v2 = vsel %vm84_vm0, %v73_v58, 0.0  ;;  %v31_v19 = vld [vmem:[%s763_s0 + $0x78] sm:$0xff] }
  0x11   :  { %v145_v3 = vsel %vm84_vm0, %v72_v59, 0.0  ;;  %v81_v4 = vmul.f32 %v480_v1, %v45_v0  ;;  %v151_v6 = vsel %vm84_vm0, %v74_v61, 0.0  ;;  %v82_v9 = vmul.f32 %v480_v1, %v46_v5  ;;  %v27_v24 = vld [vmem:[%s763_s0 + $0x58] sm:$0xff] }
  0x12   :  { %v127_v63 = vsel %vm84_vm0, %v66_v62, 0.0  ;;  %v76_v13 = vmul.f32 %v480_v1, %v40_v7  ;;  %v75_v14 = vmul.f32 %v480_v1, %v39_v8  ;;  %v77_v16 = vmul.f32 %v480_v1, %v41_v10 }
  0x13   :  { %v172_v11 = vsel %vm84_vm0, %v81_v4, 0.0  ;;  %v175_v12 = vsel %vm84_vm0, %v82_v9, 0.0  ;;  %v83_v17 = vmul.f32 %v480_v1, %v47_v15  ;;  %v67_v22 = vmul.f32 %v480_v1, %v31_v19 }
  0x14   :  { %v157_v20 = vsel %vm84_vm0, %v76_v13, 0.0  ;;  %v154_v21 = vsel %vm84_vm0, %v75_v14, 0.0  ;;  %v160_v23 = vsel %vm84_vm0, %v77_v16, 0.0  ;;  %v63_v28 = vmul.f32 %v480_v1, %v27_v24 }
  0x15   :  { %107 = vadd.xlane.f32.xlu1 %v106_v25  ;;  %v178_v18 = vsel %vm84_vm0, %v83_v17, 0.0  ;;  %v42_v25 = vld [vmem:[%s763_s0 + $0xd0] sm:$0xff]  ;;  %v311_v38 = vlaneseq  ;;  %vm324_vm3 = vcmask 261312   ;;  %vm328_vm4 = vcmask 326912  }
  0x16   :  { %104 = vadd.xlane.f32.xlu0 %v103_v26  ;;  %v43_v26 = vld [vmem:[%s763_s0 + $0xd8] sm:$0xff]  ;;  %v78_v29 = vmul.f32 %v480_v1, %v42_v25  ;;  %v118_v31 = vsel %vm84_vm0, %v63_v28, 0.0  ;;  %vm332_vm5 = vcmask 392512   ;;  %vm336_vm6 = vcmask 458112  }
  0x17   :  { %110 = vadd.xlane.f32.xlu2 %v109_v27  ;;  %v130_v27 = vsel %vm84_vm0, %v67_v22, 0.0  ;;  %v79_v30 = vmul.f32 %v480_v1, %v43_v26  ;;  %v645_v1 = vstv %s765_s2  ;;  %v649_v41 = vand.u32 127, %v311_v38  ;;  %s453_s2 = smov [#allocation3]  }
  0x18   :  { %v163_v32 = vsel %vm84_vm0, %v78_v29, 0.0  ;;  %vm340_vm7 = vcmask 523712   ;;  %vm344_vm8 = vcmask 589312   ;;  %vm348_vm9 = vcmask 654912   ;;  %s414_s22 = sshll.u32 %s453_s2, 4  ;;  %s415_s22 = int_to_ptr.vmem [resolvable:$true] %s414_s22 }
  0x19   :  { %v166_v33 = vsel %vm84_vm0, %v79_v30, 0.0  ;;  %v656_v50 = vadd.s32 4294967280, %v649_v41  ;;  %v675_v17 = vadd.s32 4294967264, %v649_v41  ;;  %v678_v19 = vadd.s32 4294967272, %v649_v41 }
  0x1a   :  { %vm352_vm10 = vcmask 720512   ;;  %vm356_vm11 = vcmask 786112   ;;  %vm360_vm12 = vcmask 851712   ;;  %vm364_vm13 = vcmask 917312  }
  0x1b   :  { %vm368_vm14 = vcmask 982912   ;;  %vm372_vm15 = vcmask 1048512   ;;  %vm405_vm0 = vcmask 1041409  }
  0x1d   :  { %116 = vadd.xlane.f32.xlu1 %v115_v34 }
  0x1e   :  { %113 = vadd.xlane.f32.xlu0 %v112_v35 }
  0x1f   :  { %134 = vadd.xlane.f32.xlu2 %v133_v36 }
  0x25   :  { %140 = vadd.xlane.f32.xlu1 %v139_v47 }
  0x26   :  { %137 = vadd.xlane.f32.xlu0 %v136_v48  ;;  %v653_v48 = vadd.s32 4294967288, %v649_v41 }
  0x27   :  { %143 = vadd.xlane.f32.xlu2 %v142_v51 }
  0x2d   :  { %149 = vadd.xlane.f32.xlu1 %v148_v2 }
  0x2e   :  { %146 = vadd.xlane.f32.xlu0 %v145_v3 }
  0x2f   :  { %152 = vadd.xlane.f32.xlu2 %v151_v6 }
  0x35   :  { %158 = vadd.xlane.f32.xlu1 %v157_v20 }
  0x36   :  { %155 = vadd.xlane.f32.xlu0 %v154_v21 }
  0x37   :  { %161 = vadd.xlane.f32.xlu2 %v160_v23 }
  0x3d   :  { %119 = vadd.xlane.f32.xlu1 %v118_v31 }
  0x3e   :  { %164 = vadd.xlane.f32.xlu0 %v163_v32 }
  0x3f   :  { %167 = vadd.xlane.f32.xlu2 %v166_v33 }
  0x45   :  { %170 = vadd.xlane.f32.xlu1 %v556_v45 }
  0x46   :  { %122 = vadd.xlane.f32.xlu0 %v121_v56 }
  0x47   :  { %125 = vadd.xlane.f32.xlu2 %v124_v57 }
  0x4d   :  { %128 = vadd.xlane.f32.xlu1 %v127_v63 }
  0x4e   :  { %173 = vadd.xlane.f32.xlu0 %v172_v11 }
  0x4f   :  { %176 = vadd.xlane.f32.xlu2 %v175_v12 }
  0x55   :  { %179 = vadd.xlane.f32.xlu1 %v178_v18 }
  0x56   :  { %131 = vadd.xlane.f32.xlu0 %v130_v27  ;;  %v683_v27 = vadd.s32 4294967256, %v649_v41 }
  0x78   :  { %v93_v34 = vpop.xlane.xlu1 %92 }
  0x79   :  { %v87_v35 = vpop.xlane.xlu0 %86  ;;  %v185_v39 = vadd.f32 %v645_v1, %v93_v34  ;;  %v687_v34 = vadd.s32 4294967240, %v649_v41 }
  0x7a   :  { %v99_v36 = vpop.xlane.xlu2 %98  ;;  %v183_v37 = vadd.f32 %v645_v1, %v87_v35 }
  0x7b   :  { %v217_v42 = vmax.f32 %v185_v39, 0.0  ;;  %v187_v10 = vadd.f32 %v645_v1, %v99_v36 }
  0x7c   :  { %v215_v40 = vmax.f32 %v183_v37, 0.0 }
  0x7d   :  { %v249_v51 = vadd.f32 0.1, %v217_v42  ;;  %v219_v18 = vmax.f32 %v187_v10, 0.0 }
  0x7e   :  { %v247_v47 = vadd.f32 0.1, %v215_v40 }
  0x7f   :  { %v319_v55 = vperm.slane %v249_v51, %v656_v50  ;;  %v251_v33 = vadd.f32 0.1, %v219_v18 }
  0x80   :  { %v96_v43 = vpop.xlane.xlu1 %95  ;;  %v313_v53 = vperm.slane %v247_v47, %v649_v41 }
  0x81   :  { %v90_v44 = vpop.xlane.xlu0 %89  ;;  %v186_v4 = vadd.f32 %v645_v1, %v96_v43 }
  0x82   :  { %v184_v45 = vadd.f32 %v645_v1, %v90_v44  ;;  %v102_v46 = vpop.xlane.xlu2 %101 }
  0x83   :  { %v218_v11 = vmax.f32 %v186_v4, 0.0  ;;  %v188_v12 = vadd.f32 %v645_v1, %v102_v46  ;;  %v695_v46 = vadd.s32 4294967248, %v649_v41 }
  0x84   :  { %v216_v49 = vmax.f32 %v184_v45, 0.0 }
  0x85   :  { %v250_v21 = vadd.f32 0.1, %v218_v11  ;;  %v220_v22 = vmax.f32 %v188_v12, 0.0 }
  0x86   :  { %v248_v52 = vadd.f32 0.1, %v216_v49 }
  0x87   :  { %v323_v37 = vperm.slane %v250_v21, %v678_v19  ;;  %v252_v38 = vadd.f32 0.1, %v220_v22 }
  0x88   :  { %v315_v54 = vperm.slane %v248_v52, %v653_v48  ;;  %v108_v56 = vpop.xlane.xlu1 %107 }
  0x89   :  { %v105_v57 = vpop.xlane.xlu0 %104  ;;  %v190_v28 = vadd.f32 %v645_v1, %v108_v56  ;;  %v331_v56 = vperm.slane %v252_v38, %v683_v27 }
  0x8a   :  { %v317_v58 = vsel %vm316_vm1, %v315_v54, %v313_v53  ;;  %v111_v59 = vpop.xlane.xlu2 %110  ;;  %v189_v16 = vadd.f32 %v645_v1, %v105_v57 }
  0x8b   :  { %v321_v60 = vsel %vm320_vm2, %v319_v55, %v317_v58  ;;  %v222_v42 = vmax.f32 %v190_v28, 0.0  ;;  %v191_v43 = vadd.f32 %v645_v1, %v111_v59  ;;  %v327_v55 = vperm.slane %v251_v33, %v675_v17 }
  0x8c   :  { %v221_v32 = vmax.f32 %v189_v16, 0.0  ;;  %v325_v51 = vsel %vm324_vm3, %v323_v37, %v321_v60 }
  0x8d   :  { %v329_v4 = vsel %vm328_vm4, %v327_v55, %v325_v51 }
  0x8e   :  { %v253_v47 = vadd.f32 0.1, %v221_v32  ;;  %v346_v32 = vadd.s32 4294967224, %v649_v41 }
  0x90   :  { %v663_v61 = vpop.xlane.xlu1 %116 }
  0x91   :  { %v665_v62 = vpop.xlane.xlu0 %113 }
  0x92   :  { %v135_v63 = vpop.xlane.xlu2 %134 }
  0x93   :  { %v199_v7 = vadd.f32 %v645_v1, %v135_v63  ;;  %v254_v63 = vadd.f32 0.1, %v222_v42 }
  0x95   :  { %v231_v14 = vmax.f32 %v199_v7, 0.0 }
  0x97   :  { %v263_v29 = vadd.f32 0.1, %v231_v14  ;;  %v339_v14 = vperm.slane %v254_v63, %v687_v34 }
  0x98   :  { %v141_v0 = vpop.xlane.xlu1 %140 }
  0x99   :  { %v138_v2 = vpop.xlane.xlu0 %137  ;;  %v201_v13 = vadd.f32 %v645_v1, %v141_v0  ;;  %v374_v44 = vperm.slane %v263_v29, %v649_v41  ;;  %v223_v0 = vmax.f32 %v191_v43, 0.0  ;;  %v350_v43 = vadd.s32 4294967216, %v649_v41 }
  0x9a   :  { %v144_v3 = vpop.xlane.xlu2 %143  ;;  %v200_v8 = vadd.f32 %v645_v1, %v138_v2  ;;  %v192_v2 = vadd.f32 %v645_v1, %v665_v62  ;;  %v193_v62 = vadd.f32 %v645_v1, %v663_v61 }
  0x9b   :  { %v202_v20 = vadd.f32 %v645_v1, %v144_v3  ;;  %v233_v23 = vmax.f32 %v201_v13, 0.0  ;;  %v333_v13 = vsel %vm332_vm5, %v331_v56, %v329_v4 }
  0x9c   :  { %v232_v15 = vmax.f32 %v200_v8, 0.0  ;;  %v224_v16 = vmax.f32 %v192_v2, 0.0 }
  0x9d   :  { %v234_v35 = vmax.f32 %v202_v20, 0.0  ;;  %v265_v39 = vadd.f32 0.1, %v233_v23 }
  0x9e   :  { %v264_v30 = vadd.f32 0.1, %v232_v15  ;;  %v255_v15 = vadd.f32 0.1, %v223_v0 }
  0x9f   :  { %v266_v52 = vadd.f32 0.1, %v234_v35  ;;  %v377_v57 = vperm.slane %v265_v39, %v656_v50  ;;  %v710_v50 = vadd.s32 4294967232, %v649_v41 }
  0xa0   :  { %v150_v5 = vpop.xlane.xlu1 %149  ;;  %v375_v45 = vperm.slane %v264_v30, %v653_v48 }
  0xa1   :  { %v147_v6 = vpop.xlane.xlu0 %146  ;;  %v204_v36 = vadd.f32 %v645_v1, %v150_v5  ;;  %v335_v5 = vperm.slane %v253_v47, %v695_v46  ;;  %v379_v8 = vperm.slane %v266_v52, %v678_v19  ;;  %v343_v30 = vperm.slane %v255_v15, %v710_v50 }
  0xa2   :  { %v153_v9 = vpop.xlane.xlu2 %152  ;;  %v203_v24 = vadd.f32 %v645_v1, %v147_v6  ;;  %v376_v60 = vsel %vm316_vm1, %v375_v45, %v374_v44 }
  0xa3   :  { %v205_v49 = vadd.f32 %v645_v1, %v153_v9  ;;  %v236_v53 = vmax.f32 %v204_v36, 0.0  ;;  %v378_v11 = vsel %vm320_vm2, %v377_v57, %v376_v60  ;;  %v337_v18 = vsel %vm336_vm6, %v335_v5, %v333_v13 }
  0xa4   :  { %v235_v40 = vmax.f32 %v203_v24, 0.0  ;;  %v380_v22 = vsel %vm324_vm3, %v379_v8, %v378_v11  ;;  %v341_v29 = vsel %vm340_vm7, %v339_v14, %v337_v18 }
  0xa5   :  { %v237_v6 = vmax.f32 %v205_v49, 0.0  ;;  %v268_v9 = vadd.f32 0.1, %v236_v53 }
  0xa6   :  { %v267_v48 = vadd.f32 0.1, %v235_v40 }
  0xa7   :  { %v269_v20 = vadd.f32 0.1, %v237_v6  ;;  %v383_v61 = vperm.slane %v268_v9, %v683_v27 }
  0xa8   :  { %v159_v25 = vpop.xlane.xlu1 %158  ;;  %v381_v12 = vperm.slane %v267_v48, %v675_v17  ;;  %v225_v17 = vmax.f32 %v193_v62, 0.0 }
  0xa9   :  { %v156_v26 = vpop.xlane.xlu0 %155  ;;  %v207_v7 = vadd.f32 %v645_v1, %v159_v25  ;;  %v385_v35 = vperm.slane %v269_v20, %v695_v46  ;;  %v345_v46 = vsel %vm344_vm8, %v343_v30, %v341_v29 }
  0xaa   :  { %v162_v31 = vpop.xlane.xlu2 %161  ;;  %v206_v54 = vadd.f32 %v645_v1, %v156_v26  ;;  %v382_v25 = vsel %vm328_vm4, %v381_v12, %v380_v22  ;;  %v257_v44 = vadd.f32 0.1, %v225_v17  ;;  %v362_v22 = vadd.s32 4294967192, %v649_v41 }
  0xab   :  { %v239_v19 = vmax.f32 %v207_v7, 0.0  ;;  %v208_v21 = vadd.f32 %v645_v1, %v162_v31  ;;  %v256_v31 = vadd.f32 0.1, %v224_v16  ;;  %v384_v38 = vsel %vm332_vm5, %v383_v61, %v382_v25 }
  0xac   :  { %v238_v10 = vmax.f32 %v206_v54, 0.0  ;;  %v386_v51 = vsel %vm336_vm6, %v385_v35, %v384_v38  ;;  %v351_v48 = vperm.slane %v257_v44, %v350_v43  ;;  %v366_v17 = vadd.s32 4294967184, %v649_v41 }
  0xad   :  { %v271_v27 = vadd.f32 0.1, %v239_v19  ;;  %v240_v36 = vmax.f32 %v208_v21, 0.0  ;;  %v347_v49 = vperm.slane %v256_v31, %v346_v32 }
  0xae   :  { %v270_v23 = vadd.f32 0.1, %v238_v10 }
  0xaf   :  { %v389_v52 = vperm.slane %v271_v27, %v710_v50  ;;  %v349_v60 = vsel %vm348_vm9, %v347_v49, %v345_v46 }
  0xb0   :  { %v120_v58 = vpop.xlane.xlu1 %119  ;;  %v387_v39 = vperm.slane %v270_v23, %v687_v34  ;;  %v272_v34 = vadd.f32 0.1, %v240_v36  ;;  %v353_v19 = vsel %vm352_vm10, %v351_v48, %v349_v60  ;;  %v370_v36 = vadd.s32 4294967176, %v649_v41 }
  0xb1   :  { %v165_v59 = vpop.xlane.xlu0 %164  ;;  %v194_v37 = vadd.f32 %v645_v1, %v120_v58  ;;  %v354_v58 = vadd.s32 4294967208, %v649_v41 }
  0xb2   :  { %v168_v3 = vpop.xlane.xlu2 %167  ;;  %v209_v24 = vadd.f32 %v645_v1, %v165_v59  ;;  %v388_v54 = vsel %vm340_vm7, %v387_v39, %v386_v51  ;;  %v391_v50 = vperm.slane %v272_v34, %v346_v32 }
  0xb3   :  { %v210_v42 = vadd.f32 %v645_v1, %v168_v3  ;;  %v226_v53 = vmax.f32 %v194_v37, 0.0  ;;  %v358_v3 = vadd.s32 4294967200, %v649_v41  ;;  %v390_v7 = vsel %vm344_vm8, %v389_v52, %v388_v54 }
  0xb4   :  { %v241_v40 = vmax.f32 %v209_v24, 0.0  ;;  %v392_v20 = vsel %vm348_vm9, %v391_v50, %v390_v7 }
  0xb5   :  { %v242_v56 = vmax.f32 %v210_v42, 0.0  ;;  %v258_v8 = vadd.f32 0.1, %v226_v53 }
  0xb6   :  { %v273_v55 = vadd.f32 0.1, %v241_v40 }
  0xb7   :  { %v274_v62 = vadd.f32 0.1, %v242_v56  ;;  %v355_v21 = vperm.slane %v258_v8, %v354_v58 }
  0xb8   :  { %v171_v26 = vpop.xlane.xlu1 %170  ;;  %v393_v10 = vperm.slane %v273_v55, %v350_v43 }
  0xb9   :  { %v123_v28 = vpop.xlane.xlu0 %122  ;;  %v211_v45 = vadd.f32 %v645_v1, %v171_v26  ;;  %v395_v23 = vperm.slane %v274_v62, %v354_v58  ;;  %v357_v27 = vsel %vm356_vm11, %v355_v21, %v353_v19 }
  0xba   :  { %v126_v33 = vpop.xlane.xlu2 %125  ;;  %v195_v47 = vadd.f32 %v645_v1, %v123_v28  ;;  %v394_v61 = vsel %vm352_vm10, %v393_v10, %v392_v20 }
  0xbb   :  { %v196_v57 = vadd.f32 %v645_v1, %v126_v33  ;;  %v243_v59 = vmax.f32 %v211_v45, 0.0  ;;  %v396_v37 = vsel %vm356_vm11, %v395_v23, %v394_v61 }
  0xbc   :  { %v227_v63 = vmax.f32 %v195_v47, 0.0 }
  0xbd   :  { %v228_v11 = vmax.f32 %v196_v57, 0.0  ;;  %v275_v13 = vadd.f32 0.1, %v243_v59 }
  0xbe   :  { %v259_v14 = vadd.f32 0.1, %v227_v63 }
  0xbf   :  { %v260_v24 = vadd.f32 0.1, %v228_v11  ;;  %v397_v25 = vperm.slane %v275_v13, %v358_v3 }
  0xc0   :  { %v129_v0 = vpop.xlane.xlu1 %128  ;;  %v359_v26 = vperm.slane %v259_v14, %v358_v3 }
  0xc1   :  { %v174_v2 = vpop.xlane.xlu0 %173  ;;  %v197_v4 = vadd.f32 %v645_v1, %v129_v0  ;;  %v363_v38 = vperm.slane %v260_v24, %v362_v22  ;;  %v398_v42 = vsel %vm360_vm12, %v397_v25, %v396_v37 }
  0xc2   :  { %v212_v5 = vadd.f32 %v645_v1, %v174_v2  ;;  %v177_v6 = vpop.xlane.xlu2 %176  ;;  %v361_v43 = vsel %vm360_vm12, %v359_v26, %v357_v27 }
  0xc3   :  { %v213_v9 = vadd.f32 %v645_v1, %v177_v6  ;;  %v229_v15 = vmax.f32 %v197_v4, 0.0 }
  0xc4   :  { %v244_v12 = vmax.f32 %v212_v5, 0.0 }
  0xc5   :  { %v245_v16 = vmax.f32 %v213_v9, 0.0  ;;  %v261_v28 = vadd.f32 0.1, %v229_v15 }
  0xc6   :  { %v276_v18 = vadd.f32 0.1, %v244_v12 }
  0xc7   :  { %v277_v29 = vadd.f32 0.1, %v245_v16  ;;  %v367_v44 = vperm.slane %v261_v28, %v366_v17 }
  0xc8   :  { %v180_v30 = vpop.xlane.xlu1 %179  ;;  %v399_v31 = vperm.slane %v276_v18, %v362_v22 }
  0xc9   :  { %v132_v32 = vpop.xlane.xlu0 %131  ;;  %v214_v33 = vadd.f32 %v645_v1, %v180_v30  ;;  %v401_v45 = vperm.slane %v277_v29, %v366_v17 }
  0xca   :  { %v198_v35 = vadd.f32 %v645_v1, %v132_v32  ;;  %v400_v47 = vsel %vm364_vm13, %v399_v31, %v398_v42  ;;  %v365_v1 = vsel %vm364_vm13, %v363_v38, %v361_v43 }
  0xcb   :  { %v246_v39 = vmax.f32 %v214_v33, 0.0  ;;  %v369_v52 = vsel %vm368_vm14, %v367_v44, %v365_v1  ;;  %v402_v34 = vsel %vm368_vm14, %v401_v45, %v400_v47 }
  0xcc   :  { %v230_v40 = vmax.f32 %v198_v35, 0.0 }
  0xcd   :  { %v278_v46 = vadd.f32 0.1, %v246_v39 }
  0xce   :  { %v262_v49 = vadd.f32 0.1, %v230_v40 }
  0xcf   :  { %v403_v41 = vperm.slane %v278_v46, %v370_v36 }
  0xd0   :  { %v371_v51 = vperm.slane %v262_v49, %v370_v36 }
  0xd1   :  { %v404_v54 = vsel %vm372_vm15, %v403_v41, %v402_v34 }
  0xd2   :  { %v373_v53 = vsel %vm372_vm15, %v371_v51, %v369_v52 }
  0xd3   :  { %v406_v55 = vsel %vm405_vm0, %v404_v54, %v373_v53 }
  0xd4   :  { %408 = vst [vmem:[#allocation3] sm:$0x3] %v406_v55 }
  0xd5   :  { %419 = dma.vmem_to_hbm [thread:$0]  %s415_s22, 32, %s417_s25, [#allocation4]  }
  0xd6   :  { %451 = dma.done.wait [#allocation4], 32  }
  0xd7   :  { %452 = vsyncadd [#allocation4], 4294967264 }
  0xd8   :  { %424 = vsyncpa [#allocation4], 1 }

</bundles_post_ra>
